<compile_context>
chip_gen: v5e
topology: v5e:2x2
jax: 0.10.0
libtpu: 0.0.40
codegen_flags: <defaults>
</compile_context>

<pallas_src>
import numpy as np
import jax
import jax.numpy as jnp
from jax.experimental import pallas as pl
from jax.experimental.pallas import tpu as pltpu


_LANE = 512          # lane-dense output width (multiple of 128)
_MAX_TILE_ROWS = 1024  # 1024 x 512 x 4B = 2 MiB per tile -> safe on v5e/v6e/v7x


def _uniform_tile_kernel(scale, zmin, hi, bits_ref, z_ref):
    """Transform one (TILE_ROWS, LANE) tile of raw uint32 bits to U[zmin, zmax)."""
    bits = bits_ref[...]
    # Top 24 bits -> u in [0, 1) with 2^-24 resolution; fold the affine map
    # into a single mul + add:  z = u24 * (width * 2^-24) + zmin.
    u24 = (bits >> jnp.uint32(8)).astype(jnp.float32)
    z = u24 * jnp.float32(scale) + jnp.float32(zmin)
    # Guarantee the open upper bound (float rounding could hit zmax exactly).
    z = jnp.minimum(z, jnp.float32(hi))
    z_ref[...] = z.astype(z_ref.dtype)


def uniform_forward(x, num_samples=1, zmin=0.0, zmax=1.0, key=None):
    """Pallas equivalent of Uniform(zmin, zmax).forward(x, num_samples)."""
    if key is None:
        key = jax.random.PRNGKey(0)

    B, D = x.shape
    S = int(num_samples)
    N = B * S * D

    width = float(zmax) - float(zmin)
    scale = width * (2.0 ** -24)                    # one mul + one add per element
    hi = float(np.nextafter(np.float32(zmax), np.float32(-np.inf)))
    log_p_val = -float(np.log(width))
    out_dtype = x.dtype

    # Lane-dense flattened slab: (rows_padded, _LANE), rows tiled over a 1-D grid.
    rows = -(-N // _LANE)                           # ceil(N / LANE)
    rows8 = ((rows + 7) // 8) * 8                   # sublane-align
    tile_rows = min(_MAX_TILE_ROWS, rows8)          # both are multiples of 8
    grid_rows = -(-rows8 // tile_rows)
    rows_padded = grid_rows * tile_rows

    # Raw uniform bits (iid uint32), generated outside the kernel.
    bits = jax.random.bits(key, (rows_padded, _LANE), dtype=jnp.uint32)

    kernel = lambda bits_ref, z_ref: _uniform_tile_kernel(
        scale, zmin, hi, bits_ref, z_ref)

    z_slab = pl.pallas_call(
        kernel,
        out_shape=jax.ShapeDtypeStruct((rows_padded, _LANE), out_dtype),
        grid=(grid_rows,),
        in_specs=[pl.BlockSpec((tile_rows, _LANE), lambda i: (i, 0))],
        out_specs=pl.BlockSpec((tile_rows, _LANE), lambda i: (i, 0)),
        compiler_params=pltpu.CompilerParams(
            dimension_semantics=("parallel",),      # shards tiles across TCs on v7x
            vmem_limit_bytes=64 * 1024 * 1024,
        ),
    )(bits)

    # Plain-JAX glue: drop padding and reshape to (B, S, D).
    z = z_slab.reshape(-1)[:N].reshape(B, S, D)

    # Constant log-prob: compile-time constant, folded by XLA for free.
    log_p = jnp.full((B, S), log_p_val, dtype=jnp.float32)
    return z, log_p


if __name__ == "__main__":
    key = jax.random.PRNGKey(0)
    kx, kz = jax.random.split(key)

    B, D, S = 2, 32, 4
    x = jax.random.normal(kx, (B, D), dtype=jnp.float32)

    zmin, zmax = 0.0, 1.0
    z, log_p = uniform_forward(x, num_samples=S, zmin=zmin, zmax=zmax, key=kz)
    z = jax.block_until_ready(z)
    log_p = jax.block_until_ready(log_p)

    # Sanity checks mirroring the PyTorch forward contract.
    assert z.shape == (B, S, D), z.shape
    assert log_p.shape == (B, S), log_p.shape
    assert z.dtype == x.dtype, z.dtype
    assert bool(jnp.all(z >= zmin)) and bool(jnp.all(z < zmax))
    expected_log_p = -np.log(zmax - zmin)
    assert np.allclose(np.asarray(log_p), expected_log_p)

    print("KERNEL_OK")
</pallas_src>

<mosaic_0001>
module attributes {stable_mosaic.version = 11 : i64} {
  func.func @_lambda_(%arg0: i32, %arg1: memref<8x512xi32, #tpu.memory_space<vmem>>, %arg2: memref<8x512xf32, #tpu.memory_space<vmem>>) attributes {dimension_semantics = [#tpu.dimension_semantics<parallel>], iteration_bounds = array<i64: 1>, scalar_prefetch = 0 : i64, scratch_operands = 0 : i64, tpu.core_type = #tpu.core_type<tc>, window_params = [{transform_indices = @transform_0, window_bounds = array<i64: 8, 512>}, {transform_indices = @transform_1, window_bounds = array<i64: 8, 512>}]} {
    %c0 = arith.constant 0 : index
    %c0_0 = arith.constant 0 : index
    %0 = vector.load %arg1[%c0, %c0_0] : memref<8x512xi32, #tpu.memory_space<vmem>>, vector<8x512xi32>
    %c8_i32 = arith.constant 8 : i32
    %1 = vector.broadcast %c8_i32 : i32 to vector<8x512xi32>
    %2 = arith.shrui %0, %1 : vector<8x512xi32>
    %3 = arith.uitofp %2 : vector<8x512xi32> to vector<8x512xf32>
    %cst = arith.constant 5.96046448E-8 : f32
    %4 = vector.broadcast %cst : f32 to vector<8x512xf32>
    %5 = arith.mulf %3, %4 : vector<8x512xf32>
    %cst_1 = arith.constant 0.000000e+00 : f32
    %6 = vector.broadcast %cst_1 : f32 to vector<8x512xf32>
    %7 = arith.addf %5, %6 : vector<8x512xf32>
    %cst_2 = arith.constant 0.99999994 : f32
    %8 = vector.broadcast %cst_2 : f32 to vector<8x512xf32>
    %9 = arith.minimumf %7, %8 : vector<8x512xf32>
    %c0_3 = arith.constant 0 : index
    %c0_4 = arith.constant 0 : index
    %10 = vector.load %arg2[%c0_3, %c0_4] : memref<8x512xf32, #tpu.memory_space<vmem>>, vector<8x512xf32>
    tpu.vector_store %arg2[%c0_3, %c0_4], %9 {strides = array<i32>} : memref<8x512xf32, #tpu.memory_space<vmem>>, vector<8x512xf32>,
    return
  }
  func.func @transform_0(%arg0: i32) -> (i32, i32) {
    %c0_i32 = arith.constant 0 : i32
    %c0_i32_0 = arith.constant 0 : i32
    return %arg0, %c0_i32 : i32, i32
  }
  func.func @transform_1(%arg0: i32) -> (i32, i32) {
    %c0_i32 = arith.constant 0 : i32
    %c0_i32_0 = arith.constant 0 : i32
    return %arg0, %c0_i32 : i32, i32
  }
}

</mosaic_0001>

<bundles_post_ra>
// kernel: tpu_custom_call.1
= control target key start
LH: loop header
LB: loop body
LE: loop exit
PB: predicated region body
PF: predicated region fallthrough
CT: control target
= control target key end

     0   :  { %6 = vsyncpa [#allocation3], 0  ;;  %s160_s0 = inlined_call_operand.hbm [shape: u32[8,512], index: 0, kind: input, shape index: {}]   ;;  %s161_s1 = inlined_call_operand.hbm [shape: f32[8,512], index: 1, kind: output, shape index: {}]  }
   0x1   :  { %7 = vsyncpa [#allocation4], 0  ;;  %s13_s8 = sshll.u32 %s160_s0, 4  ;;  %s142_s9 = smov [#allocation2]   ;;  %s14_s8 = int_to_ptr.hbm [resolvable:$true] %s13_s8 }
   0x2   :  { %s15_s10 = sshll.u32 %s142_s9, 4  ;;  %s16_s10 = int_to_ptr.vmem [resolvable:$true] %s15_s10 }
   0x3   :  { %18 = dma.hbm_to_vmem [thread:$0]  %s14_s8, 512, %s16_s10, [#allocation3]  }
   0x4   :  { %138 = dma.done.wait [#allocation3], 512  }
   0x5   :  { %139 = vsyncadd [#allocation3], 4294966784  ;;  %v23_v0 = vld [vmem:[#allocation2] sm:$0xff]  ;;  %v24_v1 = vld [vmem:[#allocation2 + $0x8] sm:$0xff]  ;;  %s143_s0 = smov [#allocation5]   ;;  %s78_s14 = sshll.u32 %s161_s1, 4  ;;  %s79_s14 = int_to_ptr.hbm [resolvable:$true] %s78_s14 }
   0x6   :  { %v25_v2 = vld [vmem:[#allocation2 + $0x10] sm:$0xff]  ;;  %v27_v3 = vshrl.u32 %v23_v0, 8  ;;  %v28_v4 = vshrl.u32 %v24_v1, 8  ;;  %v26_v6 = vld [vmem:[#allocation2 + $0x18] sm:$0xff]  ;;  %s76_s11 = sshll.u32 %s143_s0, 4  ;;  %s77_s11 = int_to_ptr.vmem [resolvable:$true] %s76_s11 }
   0x7   :  { %v29_v5 = vshrl.u32 %v25_v2, 8  ;;  %v30_v7 = vshrl.u32 %v26_v6, 8 }
   0x8   :  { %v31_v8 = vshrl.u32 %v27_v3, 16  ;;  %v32_v9 = vand.u32 65535, %v27_v3  ;;  %v37_v10 = vshrl.u32 %v28_v4, 16  ;;  %v38_v11 = vand.u32 65535, %v28_v4 }
   0x9   :  { %v43_v12 = vshrl.u32 %v29_v5, 16  ;;  %v44_v13 = vand.u32 65535, %v29_v5  ;;  %v49_v14 = vshrl.u32 %v30_v7, 16  ;;  %v50_v15 = vand.u32 65535, %v30_v7 }
   0xa   :  { %v33_v16 = vcvt.s32.f32 %v31_v8  ;;  %v35_v17 = vcvt.s32.f32 %v32_v9  ;;  %v39_v18 = vcvt.s32.f32 %v37_v10  ;;  %v41_v19 = vcvt.s32.f32 %v38_v11 }
   0xb   :  { %v45_v20 = vcvt.s32.f32 %v43_v12  ;;  %v47_v21 = vcvt.s32.f32 %v44_v13  ;;  %v51_v22 = vcvt.s32.f32 %v49_v14  ;;  %v53_v23 = vcvt.s32.f32 %v50_v15 }
   0xc   :  { %v34_v24 = vmul.f32 65536.0, %v33_v16  ;;  %v40_v25 = vmul.f32 65536.0, %v39_v18 }
   0xd   :  { %v46_v26 = vmul.f32 65536.0, %v45_v20  ;;  %v52_v27 = vmul.f32 65536.0, %v51_v22 }
   0xe   :  { %v36_v28 = vadd.f32 %v35_v17, %v34_v24  ;;  %v42_v29 = vadd.f32 %v41_v19, %v40_v25 }
   0xf   :  { %v48_v30 = vadd.f32 %v47_v21, %v46_v26  ;;  %v54_v31 = vadd.f32 %v53_v23, %v52_v27 }
  0x10   :  { %v55_v32 = vmul.f32 5.9604645e-08, %v36_v28  ;;  %v56_v33 = vmul.f32 5.9604645e-08, %v42_v29 }
  0x11   :  { %v57_v34 = vmul.f32 5.9604645e-08, %v48_v30  ;;  %v58_v35 = vmul.f32 5.9604645e-08, %v54_v31 }
  0x12   :  { %v63_v36 = vmin.f32 %v55_v32, 0.99999994  ;;  %v64_v37 = vmin.f32 %v56_v33, 0.99999994 }
  0x13   :  { %v65_v38 = vmin.f32 %v57_v34, 0.99999994  ;;  %v66_v39 = vmin.f32 %v58_v35, 0.99999994 }
  0x14   :  { %67 = vst [vmem:[#allocation5] sm:$0xff] %v63_v36 }
  0x15   :  { %68 = vst [vmem:[#allocation5 + $0x8] sm:$0xff] %v64_v37 }
  0x16   :  { %69 = vst [vmem:[#allocation5 + $0x10] sm:$0xff] %v65_v38 }
  0x17   :  { %70 = vst [vmem:[#allocation5 + $0x18] sm:$0xff] %v66_v39 }
  0x18   :  { %81 = dma.vmem_to_hbm [thread:$0]  %s77_s11, 512, %s79_s14, [#allocation4]  }
  0x19   :  { %140 = dma.done.wait [#allocation4], 512  }
  0x1a   :  { %141 = vsyncadd [#allocation4], 4294966784 }
  0x1b   :  { %86 = vsyncpa [#allocation3], 1 }
  0x1c   :  { %87 = vsyncpa [#allocation4], 1 }

</bundles_post_ra>
